<compile_context>
chip_gen: v5e
topology: v5e:2x2
jax: 0.10.0
libtpu: 0.0.40
codegen_flags: <defaults>
</compile_context>

<pallas_src>
import numpy as np
import jax
import jax.numpy as jnp
from jax.experimental import pallas as pl
from jax.experimental.pallas import tpu as pltpu

SUBLANE = 8
LANE = 128


def _round_up(x, m):
    return (x + m - 1) // m * m


def _pad_gates(m, H, Hp):
    """Pad the last dim (4*H, PyTorch gate order i,f,g,o) to 4*Hp per gate."""
    lead = m.shape[:-1]
    m4 = m.reshape(lead + (4, H))
    m4 = jnp.pad(m4, [(0, 0)] * len(lead) + [(0, 0), (0, Hp - H)])
    return m4.reshape(lead + (4 * Hp,))


# ---------------------------------------------------------------------------
# Tiled matmul + bias kernels (hoisted input / output projections).
# f32 output: accumulate directly into the VMEM-resident output block.
# bf16 output: keep an f32 scratch accumulator, cast once on the last k step.
# ---------------------------------------------------------------------------
def _linear_bias_acc_out_kernel(x_ref, w_ref, b_ref, o_ref):
    k = pl.program_id(2)

    @pl.when(k == 0)
    def _():
        o_ref[...] = jnp.zeros_like(o_ref)

    o_ref[...] += jnp.dot(x_ref[...], w_ref[...],
                          preferred_element_type=jnp.float32)

    @pl.when(k == pl.num_programs(2) - 1)
    def _():
        o_ref[...] += b_ref[...]


def _linear_bias_scratch_kernel(x_ref, w_ref, b_ref, o_ref, acc_ref):
    k = pl.program_id(2)

    @pl.when(k == 0)
    def _():
        acc_ref[...] = jnp.zeros_like(acc_ref)

    acc_ref[...] += jnp.dot(x_ref[...], w_ref[...],
                            preferred_element_type=jnp.float32)

    @pl.when(k == pl.num_programs(2) - 1)
    def _():
        o_ref[...] = (acc_ref[...] + b_ref[...]).astype(o_ref.dtype)


def linear_bias(x, w, b, *, out_dtype=jnp.float32, tm=256, tn=512, tk=512):
    """out[M,N] = x[M,K] @ w[K,N] + b[1,N]; bf16 operands, f32 accumulation."""
    M, K = x.shape
    Kw, N = w.shape
    assert K == Kw and b.shape == (1, N)

    # Tile selection; pad ragged dims to tile multiples instead of asserting.
    tm = min(tm, _round_up(M, SUBLANE))
    tn = N if N <= tn else (tn if N % tn == 0 else LANE)
    tk = K if K <= tk else (tk if K % tk == 0 else LANE)
    Mp, Np, Kp = _round_up(M, tm), _round_up(N, tn), _round_up(K, tk)
    if Mp != M or Kp != K:
        x = jnp.pad(x, ((0, Mp - M), (0, Kp - K)))
    if Kp != K or Np != N:
        w = jnp.pad(w, ((0, Kp - K), (0, Np - N)))
    if Np != N:
        b = jnp.pad(b, ((0, 0), (0, Np - N)))

    grid = (Mp // tm, Np // tn, Kp // tk)
    use_scratch = np.dtype(out_dtype) != np.dtype(jnp.float32)
    kernel = _linear_bias_scratch_kernel if use_scratch else _linear_bias_acc_out_kernel
    scratch = [pltpu.VMEM((tm, tn), jnp.float32)] if use_scratch else []

    out = pl.pallas_call(
        kernel,
        out_shape=jax.ShapeDtypeStruct((Mp, Np), out_dtype),
        grid_spec=pltpu.PrefetchScalarGridSpec(
            num_scalar_prefetch=0,
            grid=grid,
            in_specs=[
                pl.BlockSpec((tm, tk), lambda i, j, k: (i, k)),
                pl.BlockSpec((tk, tn), lambda i, j, k: (k, j)),
                pl.BlockSpec((1, tn), lambda i, j, k: (0, j)),
            ],
            out_specs=pl.BlockSpec((tm, tn), lambda i, j, k: (i, j)),
            scratch_shapes=scratch,
        ),
        compiler_params=pltpu.CompilerParams(
            dimension_semantics=("parallel", "parallel", "arbitrary")),
    )(x, w, b)
    if Mp != M or Np != N:
        out = out[:M, :N]
    return out


# ---------------------------------------------------------------------------
# LSTM recurrence: gates_x already holds x@W_ih + (b_ih+b_hh) in bf16, so each
# step is one (bt,Hp)@(Hp,4Hp) dot + gate nonlinearities.  h/c carried in f32
# VMEM scratch across the sequential time axis; `C` steps per grid iteration;
# leading batch-parallel grid axis for v7x's two TensorCores.
# ---------------------------------------------------------------------------
def lstm_recurrence(gates_x, w_hh, h0, c0, *, seq_len, time_chunk):
    Bp, Tp, G = gates_x.shape
    Hp = h0.shape[-1]
    C = time_chunk
    assert Tp % C == 0
    nt = Tp // C
    j_last = (seq_len - 1) % C            # position of t = T-1 inside the last chunk
    # Split batch across cores when possible (no-op / harmless on 1-TC chips).
    bt = Bp // 2 if (Bp >= 16 and (Bp // 2) % SUBLANE == 0) else Bp
    nb = Bp // bt

    def kernel(gx_ref, whh_ref, h0_ref, c0_ref,
               h_all_ref, h_out_ref, c_out_ref, h_sc, c_sc):
        s = pl.program_id(1)

        @pl.when(s == 0)
        def _():
            h_sc[...] = h0_ref[...]
            c_sc[...] = c0_ref[...]

        for j in range(C):                # static unroll of the time chunk
            h_prev = h_sc[...]
            c_prev = c_sc[...]
            # gates = (x@W_ih + b) + h@W_hh ; PyTorch gate order i, f, g, o.
            # W_hh streamed from its VMEM ref inside the loop (no hoisted value).
            gates = gx_ref[:, j, :].astype(jnp.float32) + jnp.dot(
                h_prev.astype(whh_ref.dtype), whh_ref[...],
                preferred_element_type=jnp.float32)
            i_g = jax.nn.sigmoid(gates[:, 0 * Hp:1 * Hp])   # 128-lane aligned slices
            f_g = jax.nn.sigmoid(gates[:, 1 * Hp:2 * Hp])
            g_g = jnp.tanh(gates[:, 2 * Hp:3 * Hp])
            o_g = jax.nn.sigmoid(gates[:, 3 * Hp:4 * Hp])
            c_new = f_g * c_prev + i_g * g_g
            h_new = o_g * jnp.tanh(c_new)
            h_sc[...] = h_new
            c_sc[...] = c_new
            h_all_ref[:, j, :] = h_new.astype(h_all_ref.dtype)   # bf16 store
            if j == j_last:
                # Exact (h, c) at t = seq_len-1; padded tail steps after this
                # only write rows that get sliced off.
                @pl.when(s == pl.num_programs(1) - 1)
                def _():
                    h_out_ref[...] = h_new
                    c_out_ref[...] = c_new

    return pl.pallas_call(
        kernel,
        out_shape=(
            jax.ShapeDtypeStruct((Bp, Tp, Hp), jnp.bfloat16),   # h_t for every t
            jax.ShapeDtypeStruct((Bp, Hp), jnp.float32),        # h_{T-1}
            jax.ShapeDtypeStruct((Bp, Hp), jnp.float32),        # c_{T-1}
        ),
        grid_spec=pltpu.PrefetchScalarGridSpec(
            num_scalar_prefetch=0,
            grid=(nb, nt),
            in_specs=[
                pl.BlockSpec((bt, C, G), lambda b, s: (b, s, 0)),   # gates_x chunk (bf16)
                pl.BlockSpec((Hp, G), lambda b, s: (0, 0)),         # W_hh (constant index)
                pl.BlockSpec((bt, Hp), lambda b, s: (b, 0)),        # h0
                pl.BlockSpec((bt, Hp), lambda b, s: (b, 0)),        # c0
            ],
            out_specs=(
                pl.BlockSpec((bt, C, Hp), lambda b, s: (b, s, 0)),  # h_all chunk
                pl.BlockSpec((bt, Hp), lambda b, s: (b, 0)),        # h_T (resident)
                pl.BlockSpec((bt, Hp), lambda b, s: (b, 0)),        # c_T (resident)
            ),
            scratch_shapes=[
                pltpu.VMEM((bt, Hp), jnp.float32),                  # h carry (f32)
                pltpu.VMEM((bt, Hp), jnp.float32),                  # c carry (f32)
            ],
        ),
        compiler_params=pltpu.CompilerParams(
            dimension_semantics=("parallel", "arbitrary")),         # batch ||, time serial
    )(gates_x, w_hh, h0, c0)


# ---------------------------------------------------------------------------
# Parameter prep (bf16 weights, lane/sublane-friendly padding) and forward.
# ---------------------------------------------------------------------------
def prepare_params(params, hidden_dim, vocab_size):
    H, V = hidden_dim, vocab_size
    Hp = _round_up(H, LANE)
    Vp = _round_up(V, LANE)
    emb = params["embedding"].astype(jnp.bfloat16)    # padding_idx row stays exactly 0
    w_ih = _pad_gates(params["w_ih"], H, Hp).astype(jnp.bfloat16)          # (E, 4Hp)
    w_hh = _pad_gates(params["w_hh"], H, Hp)
    w_hh = jnp.pad(w_hh, ((0, Hp - H), (0, 0))).astype(jnp.bfloat16)       # (Hp, 4Hp)
    b = _pad_gates(params["b"], H, Hp)                                     # (1, 4Hp) f32
    w_out = jnp.pad(params["w_out"],
                    ((0, Hp - H), (0, Vp - V))).astype(jnp.bfloat16)       # (Hp, Vp)
    b_out = jnp.pad(params["b_out"], ((0, 0), (0, Vp - V)))                # (1, Vp) f32
    return dict(embedding=emb, w_ih=w_ih, w_hh=w_hh, b=b,
                w_out=w_out, b_out=b_out, H=H, Hp=Hp, V=V, Vp=Vp)


def decoder_forward(seq, encoder_state, dev, *, time_chunk=8):
    """seq: (B, T) int32; encoder_state: ((1,B,H), (1,B,H)).
    Returns (logits (B,T,V) f32, ((1,B,H), (1,B,H)))."""
    H, Hp, V, Vp = dev["H"], dev["Hp"], dev["V"], dev["Vp"]
    B, T = seq.shape
    Bp = _round_up(B, SUBLANE)
    C = time_chunk if T >= time_chunk else T          # chunk; T padded to a multiple
    Tp = _round_up(T, C)

    h0, c0 = encoder_state
    h0 = jnp.pad(h0[0].astype(jnp.float32), ((0, Bp - B), (0, Hp - H)))   # (Bp, Hp)
    c0 = jnp.pad(c0[0].astype(jnp.float32), ((0, Bp - B), (0, Hp - H)))

    # TODO(synk): embedding gather stays in plain JAX (a DMA-gather kernel is possible).
    x = jnp.take(dev["embedding"], seq, axis=0)                 # (B, T, E) bf16, batch-major
    x = jnp.pad(x, ((0, Bp - B), (0, Tp - T), (0, 0)))          # (Bp, Tp, E)
    E = x.shape[-1]

    # (1) Hoisted input projection: (Bp*Tp, E)@(E, 4Hp) + bias, bf16 output.
    gates_x = linear_bias(x.reshape(Bp * Tp, E), dev["w_ih"], dev["b"],
                          out_dtype=jnp.bfloat16)
    gates_x = gates_x.reshape(Bp, Tp, 4 * Hp)

    # (2) Serial recurrence, C steps per grid iteration, bf16 h_all.
    h_all, h_last, c_last = lstm_recurrence(gates_x, dev["w_hh"], h0, c0,
                                            seq_len=T, time_chunk=C)

    # (3) Hoisted output projection: (Bp*Tp, Hp)@(Hp, Vp) + bias, f32, batch-major.
    logits = linear_bias(h_all.reshape(Bp * Tp, Hp), dev["w_out"], dev["b_out"],
                         out_dtype=jnp.float32)
    logits = logits.reshape(Bp, Tp, Vp)[:B, :T, :V]             # no transpose needed
    state = (h_last[:B, :H][None], c_last[:B, :H][None])
    return logits, state


# ---------------------------------------------------------------------------
# Init + pure-JAX reference (same math as torch.nn.LSTM + Linear, f32).
# ---------------------------------------------------------------------------
def init_params(key, vocab_size, embedding_dim, hidden_dim, pad_id):
    ks = jax.random.split(key, 6)
    emb = 0.1 * jax.random.normal(ks[0], (vocab_size, embedding_dim), jnp.float32)
    emb = emb.at[pad_id].set(0.0)   # nn.Embedding padding_idx row is zero
    w_ih = 0.1 * jax.random.normal(ks[1], (embedding_dim, 4 * hidden_dim), jnp.float32)
    w_hh = 0.1 * jax.random.normal(ks[2], (hidden_dim, 4 * hidden_dim), jnp.float32)
    b = 0.1 * jax.random.normal(ks[3], (1, 4 * hidden_dim), jnp.float32)  # b_ih + b_hh
    w_out = 0.1 * jax.random.normal(ks[4], (hidden_dim, vocab_size), jnp.float32)
    b_out = 0.1 * jax.random.normal(ks[5], (1, vocab_size), jnp.float32)
    return dict(embedding=emb, w_ih=w_ih, w_hh=w_hh, b=b, w_out=w_out, b_out=b_out)


def decoder_reference(seq, encoder_state, params):
    x = jnp.take(params["embedding"], seq, axis=0)   # (B, T, E)
    h0, c0 = encoder_state
    h, c = h0[0], c0[0]
    H = h.shape[-1]

    def step(carry, x_t):
        h, c = carry
        gates = x_t @ params["w_ih"] + h @ params["w_hh"] + params["b"]
        i = jax.nn.sigmoid(gates[:, :H])
        f = jax.nn.sigmoid(gates[:, H:2 * H])
        g = jnp.tanh(gates[:, 2 * H:3 * H])
        o = jax.nn.sigmoid(gates[:, 3 * H:])
        c = f * c + i * g
        h = o * jnp.tanh(c)
        return (h, c), h @ params["w_out"] + params["b_out"]

    (h, c), logits_tm = jax.lax.scan(step, (h, c), jnp.transpose(x, (1, 0, 2)))
    return jnp.transpose(logits_tm, (1, 0, 2)), (h[None], c[None])


def _check(seq, h0, c0, dev_params, ref_params, atol=2e-2):
    logits, (h_t, c_t) = decoder_forward(seq, (h0, c0), dev_params, time_chunk=8)
    jax.block_until_ready(logits)
    jax.block_until_ready(h_t)
    jax.block_until_ready(c_t)
    ref_logits, (ref_h, ref_c) = decoder_reference(seq, (h0, c0), ref_params)
    assert np.allclose(np.asarray(logits), np.asarray(ref_logits), atol=atol), "logits mismatch"
    assert np.allclose(np.asarray(h_t), np.asarray(ref_h), atol=atol), "h_T mismatch"
    assert np.allclose(np.asarray(c_t), np.asarray(ref_c), atol=atol), "c_T mismatch"


if __name__ == "__main__":
    vocab_size, embedding_dim, hidden_dim = 32, 32, 32
    CHAR2ID = {" ": 0}

    key = jax.random.PRNGKey(0)
    kp, kseq, kh, kc, kseq2, kh2, kc2 = jax.random.split(key, 7)
    params = init_params(kp, vocab_size, embedding_dim, hidden_dim, CHAR2ID[" "])
    dev_params = prepare_params(params, hidden_dim, vocab_size)

    # Reference in f32 using the same bf16-rounded weight values (so only the
    # in-kernel bf16 intermediates / accumulation order differ).
    ref_params = dict(params)
    for name in ("embedding", "w_ih", "w_hh", "w_out"):
        ref_params[name] = params[name].astype(jnp.bfloat16).astype(jnp.float32)

    # Test 1: B=2, T=8 (exact chunk multiple).
    B, T = 2, 8
    seq = jax.random.randint(kseq, (B, T), 0, vocab_size, dtype=jnp.int32)
    h0 = jax.random.normal(kh, (1, B, hidden_dim), jnp.float32)
    c0 = jax.random.normal(kc, (1, B, hidden_dim), jnp.float32)
    _check(seq, h0, c0, dev_params, ref_params)

    # Test 2: B=3, T=11 (exercises batch/time padding and the masked tail).
    B, T = 3, 11
    seq = jax.random.randint(kseq2, (B, T), 0, vocab_size, dtype=jnp.int32)
    h0 = jax.random.normal(kh2, (1, B, hidden_dim), jnp.float32)
    c0 = jax.random.normal(kc2, (1, B, hidden_dim), jnp.float32)
    _check(seq, h0, c0, dev_params, ref_params)

    print("KERNEL_OK")
</pallas_src>

<mosaic_0001>
module attributes {stable_mosaic.version = 11 : i64} {
  func.func @_linear_bias_scratch_kernel(%arg0: i32, %arg1: i32, %arg2: i32, %arg3: memref<64x32xbf16, #tpu.memory_space<vmem>>, %arg4: memref<32x512xbf16, #tpu.memory_space<vmem>>, %arg5: memref<1x512xf32, #tpu.memory_space<vmem>>, %arg6: memref<64x512xbf16, #tpu.memory_space<vmem>>, %arg7: memref<64x512xf32, #tpu.memory_space<vmem>>) attributes {dimension_semantics = [#tpu.dimension_semantics<parallel>, #tpu.dimension_semantics<parallel>, #tpu.dimension_semantics<arbitrary>], iteration_bounds = array<i64: 1, 1, 1>, scalar_prefetch = 0 : i64, scratch_operands = 1 : i64, tpu.core_type = #tpu.core_type<tc>, window_params = [{transform_indices = @transform_0, window_bounds = array<i64: 64, 32>}, {transform_indices = @transform_1, window_bounds = array<i64: 32, 512>}, {transform_indices = @transform_2, window_bounds = array<i64: 1, 512>}, {transform_indices = @transform_3, window_bounds = array<i64: 64, 512>}]} {
    %c0_i32 = arith.constant 0 : i32
    %0 = arith.cmpi eq, %arg2, %c0_i32 : i32
    %1 = arith.extui %0 : i1 to i32
    %c0_i32_0 = arith.constant 0 : i32
    %2 = arith.cmpi ne, %1, %c0_i32_0 : i32
    scf.if %2 {
      %cst_10 = arith.constant 0.000000e+00 : f32
      %12 = vector.broadcast %cst_10 : f32 to vector<64x512xf32>
      %c0_11 = arith.constant 0 : index
      %c0_12 = arith.constant 0 : index
      %13 = vector.load %arg7[%c0_11, %c0_12] : memref<64x512xf32, #tpu.memory_space<vmem>>, vector<64x512xf32>
      tpu.vector_store %arg7[%c0_11, %c0_12], %12 {strides = array<i32>} : memref<64x512xf32, #tpu.memory_space<vmem>>, vector<64x512xf32>,
    } else {
    }
    %c0 = arith.constant 0 : index
    %c0_1 = arith.constant 0 : index
    %3 = vector.load %arg7[%c0, %c0_1] : memref<64x512xf32, #tpu.memory_space<vmem>>, vector<64x512xf32>
    %c0_2 = arith.constant 0 : index
    %c0_3 = arith.constant 0 : index
    %4 = vector.load %arg3[%c0_2, %c0_3] : memref<64x32xbf16, #tpu.memory_space<vmem>>, vector<64x32xbf16>
    %c0_4 = arith.constant 0 : index
    %c0_5 = arith.constant 0 : index
    %5 = vector.load %arg4[%c0_4, %c0_5] : memref<32x512xbf16, #tpu.memory_space<vmem>>, vector<32x512xbf16>
    %cst = arith.constant dense<0.000000e+00> : vector<64x512xf32>
    %6 = tpu.matmul %4, %5, %cst {dimension_numbers = #tpu.dot_dimension_numbers<[1], [0], [0], [1], [0, 0, 1, 1], [], []>} : vector<64x32xbf16>, vector<32x512xbf16>, vector<64x512xf32> -> vector<64x512xf32>
    %7 = arith.addf %3, %6 : vector<64x512xf32>
    %c0_6 = arith.constant 0 : index
    %c0_7 = arith.constant 0 : index
    %8 = vector.load %arg7[%c0_6, %c0_7] : memref<64x512xf32, #tpu.memory_space<vmem>>, vector<64x512xf32>
    tpu.vector_store %arg7[%c0_6, %c0_7], %7 {strides = array<i32>} : memref<64x512xf32, #tpu.memory_space<vmem>>, vector<64x512xf32>,
    %c0_i32_8 = arith.constant 0 : i32
    %9 = arith.cmpi eq, %arg2, %c0_i32_8 : i32
    %10 = arith.extui %9 : i1 to i32
    %c0_i32_9 = arith.constant 0 : i32
    %11 = arith.cmpi ne, %10, %c0_i32_9 : i32
    scf.if %11 {
      %c0_10 = arith.constant 0 : index
      %c0_11 = arith.constant 0 : index
      %12 = vector.load %arg7[%c0_10, %c0_11] : memref<64x512xf32, #tpu.memory_space<vmem>>, vector<64x512xf32>
      %c0_12 = arith.constant 0 : index
      %c0_13 = arith.constant 0 : index
      %13 = vector.load %arg5[%c0_12, %c0_13] : memref<1x512xf32, #tpu.memory_space<vmem>>, vector<1x512xf32>
      %14 = vector.broadcast %13 : vector<1x512xf32> to vector<64x512xf32>
      %15 = arith.addf %12, %14 : vector<64x512xf32>
      %16 = arith.truncf %15 : vector<64x512xf32> to vector<64x512xbf16>
      %c0_14 = arith.constant 0 : index
      %c0_15 = arith.constant 0 : index
      %17 = vector.load %arg6[%c0_14, %c0_15] : memref<64x512xbf16, #tpu.memory_space<vmem>>, vector<64x512xbf16>
      tpu.vector_store %arg6[%c0_14, %c0_15], %16 {strides = array<i32>} : memref<64x512xbf16, #tpu.memory_space<vmem>>, vector<64x512xbf16>,
    } else {
    }
    return
  }
  func.func @transform_0(%arg0: i32, %arg1: i32, %arg2: i32) -> (i32, i32) {
    %c0_i32 = arith.constant 0 : i32
    return %arg0, %arg2 : i32, i32
  }
  func.func @transform_1(%arg0: i32, %arg1: i32, %arg2: i32) -> (i32, i32) {
    %c0_i32 = arith.constant 0 : i32
    return %arg2, %arg1 : i32, i32
  }
  func.func @transform_2(%arg0: i32, %arg1: i32, %arg2: i32) -> (i32, i32) {
    %c0_i32 = arith.constant 0 : i32
    %c0_i32_0 = arith.constant 0 : i32
    return %c0_i32, %arg1 : i32, i32
  }
  func.func @transform_3(%arg0: i32, %arg1: i32, %arg2: i32) -> (i32, i32) {
    %c0_i32 = arith.constant 0 : i32
    return %arg0, %arg1 : i32, i32
  }
}

</mosaic_0001>

<bundles_post_ra>
// kernel: tpu_custom_call.1
= control target key start
LH: loop header
LB: loop body
LE: loop exit
PB: predicated region body
PF: predicated region fallthrough
CT: control target
= control target key end

     0   :  { %8 = vsyncpa [#allocation4], 0  ;;  %s736_s0 = inlined_call_operand.vmem [shape: bf16[64,32], index: 0, kind: input, shape index: {}]   ;;  %s737_s1 = inlined_call_operand.hbm [shape: bf16[32,512], index: 1, kind: input, shape index: {}]   ;;  %s738_s2 = inlined_call_operand.vmem [shape: f32[1,512], index: 2, kind: input, shape index: {}]   ;;  %s739_s3 = inlined_call_operand.hbm [shape: bf16[64,512], index: 3, kind: output, shape index: {}]  }
   0x1   :  { %9 = vsyncpa [#allocation5], 0  ;;  %s16_s14 = sshll.u32 %s737_s1, 4  ;;  %s629_s15 = smov [#allocation3]   ;;  %s17_s14 = int_to_ptr.hbm [resolvable:$true] %s16_s14 }
   0x2   :  { %s18_s16 = sshll.u32 %s629_s15, 4  ;;  %s630_s17 = smov 256   ;;  %s19_s16 = int_to_ptr.vmem [resolvable:$true] %s18_s16 }
   0x3   :  { %s631_s18 = smov 16  }
   0x4   :  { %24 = dma.hbm_to_vmem [thread:$0]  %s17_s14, 1024, %s19_s16, [#allocation4], %s630_s17, %s630_s17, %s631_s18  }
   0x5   :  { %625 = dma.done.wait [#allocation4], 1024  }
   0x6   :  { %626 = vsyncadd [#allocation4], 4294966272  ;;  %v531_v0 = vld [vmem:[#allocation3 + $0x20] sm:$0xf]  ;;  %v571_v1 = vld [vmem:[#allocation3 + $0x2c] sm:$0xf0] }
   0x7   :  { %v569_v2 = vld [vmem:[#allocation3 + $0x24] sm:$0xf]  ;;  %v532_v3 = vor.u32 %v571_v1, %v531_v0  ;;  %v533_v4 = vld [vmem:[#allocation3 + $0x30] sm:$0xf0]  ;;  %v539_v5 = vld [vmem:[#allocation3 + $0x28] sm:$0xf] }
   0x8   :  { %v572_v6 = vld [vmem:[#allocation3 + $0x34] sm:$0xf0]  ;;  %v536_v7 = vor.u32 %v569_v2, %v533_v4  ;;  %v570_v9 = vld [vmem:[#allocation3 + $0x2c] sm:$0xf]  ;;  %v541_v10 = vld [vmem:[#allocation3 + $0x38] sm:$0xf0] }
   0x9   :  { %v540_v8 = vor.u32 %v572_v6, %v539_v5  ;;  %v515_v11 = vld [vmem:[#allocation3] sm:$0xf]  ;;  %195 = vmatpush.bf16.msra.mxu0 %v532_v3  ;;  %v544_v12 = vor.u32 %v570_v9, %v541_v10  ;;  %v567_v13 = vld [vmem:[#allocation3 + $0xc] sm:$0xf0]  ;;  %v565_v14 = vld [vmem:[#allocation3 + $0x4] sm:$0xf] }
   0xa   :  { %v517_v15 = vld [vmem:[#allocation3 + $0x10] sm:$0xf0]  ;;  %224 = vmatpush.bf16.msra.mxu1 %v536_v7  ;;  %v516_v16 = vor.u32 %v567_v13, %v515_v11  ;;  %v523_v18 = vld [vmem:[#allocation3 + $0x8] sm:$0xf]  ;;  %v568_v19 = vld [vmem:[#allocation3 + $0x14] sm:$0xf0] }
   0xb   :  { %253 = vmatpush.bf16.msra.mxu2 %v540_v8  ;;  %v520_v17 = vor.u32 %v565_v14, %v517_v15  ;;  %v566_v20 = vld [vmem:[#allocation3 + $0xc] sm:$0xf]  ;;  %282 = vmatpush.bf16.msra.mxu3 %v544_v12  ;;  %v524_v21 = vor.u32 %v568_v19, %v523_v18  ;;  %v525_v22 = vld [vmem:[#allocation3 + $0x18] sm:$0xf0]  ;;  %v561_v24 = vld [vmem:[%s736_s0] sm:$0xff]  ;;  %vm176_vm0 = vcmask 261120  }
   0xc   :  { %v528_v23 = vor.u32 %v566_v20, %v525_v22  ;;  %v562_v25 = vld [vmem:[%s736_s0 + $0x8] sm:$0xff]  ;;  %v563_v26 = vld [vmem:[%s736_s0 + $0x10] sm:$0xff]  ;;  %v564_v27 = vld [vmem:[%s736_s0 + $0x18] sm:$0xff]  ;;  %s632_s0 = smov [#allocation6]   ;;  %s484_s30 = sshll.u32 %s739_s3, 4  ;;  %s485_s30 = int_to_ptr.hbm [resolvable:$true] %s484_s30 }
   0xd   :  { %196 = vmatpush.bf16.msra.mxu0 %v516_v16  ;;  %v404_v28 = vld [vmem:[%s738_s2] sm:$0xf]  ;;  %s482_s2 = sshll.u32 %s632_s0, 4  ;;  %s483_s2 = int_to_ptr.vmem [resolvable:$true] %s482_s2 }
   0xe   :  { %225 = vmatpush.bf16.msra.mxu1 %v520_v17  ;;  %v690_v29 = vperm.slane %v404_v28, 0  ;;  %v692_v30 = vperm.slane %v404_v28, 1  ;;  %v696_v36 = vperm.slane %v404_v28, 2  ;;  %v698_v37 = vperm.slane %v404_v28, 3 }
   0xf   :  { %254 = vmatpush.bf16.msra.mxu2 %v524_v21  ;;  %283 = vmatpush.bf16.msra.mxu3 %v528_v23 }
  0x10   :  { %545 = vmatmul.msk.bf16.vlgmr.msra.gmra.mxu0 %vm176_vm0, %v561_v24 }
  0x11   :  { %549 = vmatmul.msk.bf16.vlgmr.msra.gmra.mxu1 %vm176_vm0, %v561_v24 }
  0x12   :  { %553 = vmatmul.msk.bf16.vlgmr.msra.gmra.mxu2 %vm176_vm0, %v561_v24  ;;  %557 = vmatmul.msk.bf16.vlgmr.msra.gmra.mxu3 %vm176_vm0, %v561_v24 }
  0x20   :  { %546 = vmatmul.msk.bf16.gmra.mxu0 %vm176_vm0, %v562_v25 }
  0x21   :  { %550 = vmatmul.msk.bf16.gmra.mxu1 %vm176_vm0, %v562_v25 }
  0x22   :  { %554 = vmatmul.msk.bf16.gmra.mxu2 %vm176_vm0, %v562_v25  ;;  %558 = vmatmul.msk.bf16.gmra.mxu3 %vm176_vm0, %v562_v25 }
  0x30   :  { %547 = vmatmul.msk.bf16.gmra.mxu0 %vm176_vm0, %v563_v26 }
  0x31   :  { %551 = vmatmul.msk.bf16.gmra.mxu1 %vm176_vm0, %v563_v26 }
  0x32   :  { %555 = vmatmul.msk.bf16.gmra.mxu2 %vm176_vm0, %v563_v26  ;;  %559 = vmatmul.msk.bf16.gmra.mxu3 %vm176_vm0, %v563_v26 }
  0x40   :  { %548 = vmatmul.msk.bf16.gmra.mxu0 %vm176_vm0, %v564_v27 }
  0x41   :  { %552 = vmatmul.msk.bf16.gmra.mxu1 %vm176_vm0, %v564_v27 }
  0x42   :  { %556 = vmatmul.msk.bf16.gmra.mxu2 %vm176_vm0, %v564_v27  ;;  %560 = vmatmul.msk.bf16.gmra.mxu3 %vm176_vm0, %v564_v27 }
  0x8d   :  { %v198_v31 = vpop.f32.mrf.mxu0 }
  0x8e   :  { %v414_v32 = vadd.f32 %v690_v29, %v198_v31  ;;  %v227_v33 = vpop.f32.mrf.mxu1 }
  0x8f   :  { %v415_v34 = vadd.f32 %v692_v30, %v227_v33 }
  0x91   :  { %v446_v35 = vpack.c.bf16 %v415_v34, %v414_v32 }
  0x93   :  { %462 = vst [vmem:[#allocation6] sm:$0xff] %v446_v35 }
  0x95   :  { %v256_v38 = vpop.f32.mrf.mxu2  ;;  %v285_v40 = vpop.f32.mrf.mxu3 }
  0x96   :  { %v416_v39 = vadd.f32 %v696_v36, %v256_v38  ;;  %v200_v41 = vpop.f32.mrf.mxu0  ;;  %v417_v42 = vadd.f32 %v698_v37, %v285_v40  ;;  %v229_v44 = vpop.f32.mrf.mxu1 }
  0x97   :  { %v418_v43 = vadd.f32 %v690_v29, %v200_v41  ;;  %v419_v45 = vadd.f32 %v692_v30, %v229_v44 }
  0x98   :  { %v447_v46 = vpack.c.bf16 %v417_v42, %v416_v39 }
  0x99   :  { %v448_v47 = vpack.c.bf16 %v419_v45, %v418_v43 }
  0x9a   :  { %463 = vst [vmem:[#allocation6 + $0x8] sm:$0xff] %v447_v46 }
  0x9b   :  { %464 = vst [vmem:[#allocation6 + $0x10] sm:$0xff] %v448_v47 }
  0x9d   :  { %v258_v48 = vpop.f32.mrf.mxu2  ;;  %v287_v50 = vpop.f32.mrf.mxu3 }
  0x9e   :  { %v420_v49 = vadd.f32 %v696_v36, %v258_v48  ;;  %v203_v51 = vpop.f32.mrf.mxu0  ;;  %v421_v52 = vadd.f32 %v698_v37, %v287_v50  ;;  %v232_v54 = vpop.f32.mrf.mxu1 }
  0x9f   :  { %v422_v53 = vadd.f32 %v690_v29, %v203_v51  ;;  %v423_v55 = vadd.f32 %v692_v30, %v232_v54 }
  0xa0   :  { %v449_v56 = vpack.c.bf16 %v421_v52, %v420_v49 }
  0xa1   :  { %v450_v57 = vpack.c.bf16 %v423_v55, %v422_v53 }
  0xa2   :  { %465 = vst [vmem:[#allocation6 + $0x18] sm:$0xff] %v449_v56 }
  0xa3   :  { %466 = vst [vmem:[#allocation6 + $0x20] sm:$0xff] %v450_v57 }
  0xa5   :  { %v261_v58 = vpop.f32.mrf.mxu2  ;;  %v290_v60 = vpop.f32.mrf.mxu3 }
  0xa6   :  { %v424_v59 = vadd.f32 %v696_v36, %v261_v58  ;;  %v205_v61 = vpop.f32.mrf.mxu0  ;;  %v425_v62 = vadd.f32 %v698_v37, %v290_v60  ;;  %v234_v0 = vpop.f32.mrf.mxu1 }
  0xa7   :  { %v426_v63 = vadd.f32 %v690_v29, %v205_v61  ;;  %v427_v1 = vadd.f32 %v692_v30, %v234_v0 }
  0xa8   :  { %v451_v2 = vpack.c.bf16 %v425_v62, %v424_v59 }
  0xa9   :  { %v452_v3 = vpack.c.bf16 %v427_v1, %v426_v63 }
  0xaa   :  { %467 = vst [vmem:[#allocation6 + $0x28] sm:$0xff] %v451_v2 }
  0xab   :  { %468 = vst [vmem:[#allocation6 + $0x30] sm:$0xff] %v452_v3 }
  0xad   :  { %v263_v4 = vpop.f32.mrf.mxu2  ;;  %v292_v6 = vpop.f32.mrf.mxu3 }
  0xae   :  { %v428_v5 = vadd.f32 %v696_v36, %v263_v4  ;;  %v208_v7 = vpop.f32.mrf.mxu0  ;;  %v429_v8 = vadd.f32 %v698_v37, %v292_v6  ;;  %v237_v10 = vpop.f32.mrf.mxu1 }
  0xaf   :  { %v430_v9 = vadd.f32 %v690_v29, %v208_v7  ;;  %v431_v11 = vadd.f32 %v692_v30, %v237_v10 }
  0xb0   :  { %v453_v12 = vpack.c.bf16 %v429_v8, %v428_v5 }
  0xb1   :  { %v454_v13 = vpack.c.bf16 %v431_v11, %v430_v9 }
  0xb2   :  { %469 = vst [vmem:[#allocation6 + $0x38] sm:$0xff] %v453_v12 }
  0xb3   :  { %470 = vst [vmem:[#allocation6 + $0x40] sm:$0xff] %v454_v13 }
  0xb5   :  { %v266_v14 = vpop.f32.mrf.mxu2  ;;  %v295_v16 = vpop.f32.mrf.mxu3 }
  0xb6   :  { %v432_v15 = vadd.f32 %v696_v36, %v266_v14  ;;  %v210_v17 = vpop.f32.mrf.mxu0  ;;  %v433_v18 = vadd.f32 %v698_v37, %v295_v16  ;;  %v239_v20 = vpop.f32.mrf.mxu1 }
  0xb7   :  { %v434_v19 = vadd.f32 %v690_v29, %v210_v17  ;;  %v435_v21 = vadd.f32 %v692_v30, %v239_v20 }
  0xb8   :  { %v455_v22 = vpack.c.bf16 %v433_v18, %v432_v15 }
  0xb9   :  { %v456_v23 = vpack.c.bf16 %v435_v21, %v434_v19 }
  0xba   :  { %471 = vst [vmem:[#allocation6 + $0x48] sm:$0xff] %v455_v22 }
  0xbb   :  { %472 = vst [vmem:[#allocation6 + $0x50] sm:$0xff] %v456_v23 }
  0xbd   :  { %v268_v24 = vpop.f32.mrf.mxu2  ;;  %v297_v26 = vpop.f32.mrf.mxu3 }
  0xbe   :  { %v436_v25 = vadd.f32 %v696_v36, %v268_v24  ;;  %v213_v27 = vpop.f32.mrf.mxu0  ;;  %v437_v28 = vadd.f32 %v698_v37, %v297_v26  ;;  %v242_v32 = vpop.f32.mrf.mxu1 }
  0xbf   :  { %v438_v31 = vadd.f32 %v690_v29, %v213_v27  ;;  %v439_v33 = vadd.f32 %v692_v30, %v242_v32 }
  0xc0   :  { %v457_v34 = vpack.c.bf16 %v437_v28, %v436_v25 }
  0xc1   :  { %v458_v35 = vpack.c.bf16 %v439_v33, %v438_v31 }
  0xc2   :  { %473 = vst [vmem:[#allocation6 + $0x58] sm:$0xff] %v457_v34 }
  0xc3   :  { %474 = vst [vmem:[#allocation6 + $0x60] sm:$0xff] %v458_v35 }
  0xc5   :  { %v271_v38 = vpop.f32.mrf.mxu2  ;;  %v300_v40 = vpop.f32.mrf.mxu3 }
  0xc6   :  { %v440_v39 = vadd.f32 %v696_v36, %v271_v38  ;;  %v215_v41 = vpop.f32.mrf.mxu0  ;;  %v441_v42 = vadd.f32 %v698_v37, %v300_v40  ;;  %v244_v44 = vpop.f32.mrf.mxu1 }
  0xc7   :  { %v442_v43 = vadd.f32 %v690_v29, %v215_v41  ;;  %v443_v45 = vadd.f32 %v692_v30, %v244_v44 }
  0xc8   :  { %v459_v46 = vpack.c.bf16 %v441_v42, %v440_v39 }
  0xc9   :  { %v460_v47 = vpack.c.bf16 %v443_v45, %v442_v43 }
  0xca   :  { %475 = vst [vmem:[#allocation6 + $0x68] sm:$0xff] %v459_v46 }
  0xcb   :  { %476 = vst [vmem:[#allocation6 + $0x70] sm:$0xff] %v460_v47 }
  0xcd   :  { %v273_v48 = vpop.f32.mrf.mxu2  ;;  %v302_v50 = vpop.f32.mrf.mxu3 }
  0xce   :  { %v444_v49 = vadd.f32 %v696_v36, %v273_v48  ;;  %v445_v51 = vadd.f32 %v698_v37, %v302_v50 }
  0xd0   :  { %v461_v29 = vpack.c.bf16 %v445_v51, %v444_v49 }
  0xd2   :  { %477 = vst [vmem:[#allocation6 + $0x78] sm:$0xff] %v461_v29 }
  0xd3   :  { %490 = dma.vmem_to_hbm [thread:$0]  %s483_s2, 2048, %s485_s30, [#allocation5], %s630_s17, %s630_s17, %s631_s18  }
  0xd4   :  { %627 = dma.done.wait [#allocation5], 2048  }
  0xd5   :  { %628 = vsyncadd [#allocation5], 4294965248 }
  0xd6   :  { %495 = vsyncpa [#allocation4], 1 }
  0xd7   :  { %496 = vsyncpa [#allocation5], 1 }

</bundles_post_ra>
